<compile_context>
chip_gen: v6e
topology: v6e:2x2x1
jax: 0.10.0
libtpu: 0.0.40
codegen_flags: <defaults>
</compile_context>

<pallas_src>
import functools

import jax
import jax.numpy as jnp
from jax import lax
from jax.experimental import pallas as pl
from jax.experimental.pallas import tpu as pltpu


def _round_up(x, m):
    return (x + m - 1) // m * m


def _unnormalize_align_corners(coord, size):
    # align_corners=True: -1 -> 0, +1 -> size-1
    return (coord + 1.0) * 0.5 * (size - 1)


def _reflect_coords(coord, size):
    # PyTorch reflect_coordinates with align_corners=True:
    # twice_low = 0, twice_high = 2*(size-1) => span = size-1, then clip.
    if size <= 1:
        return jnp.zeros_like(coord)
    span = jnp.float32(size - 1)
    c = jnp.abs(coord)
    extra = jnp.mod(c, span)
    flips = jnp.floor(c / span)
    refl = jnp.where(jnp.mod(flips, 2.0) == 0.0, extra, span - extra)
    return jnp.clip(refl, 0.0, span)


def _bilinear_coords(gx, gy, H, W):
    """Shared coordinate math (wrapper and pure-JAX reference)."""
    ix = _reflect_coords(_unnormalize_align_corners(gx, W), W)
    iy = _reflect_coords(_unnormalize_align_corners(gy, H), H)

    ix0 = jnp.floor(ix)
    iy0 = jnp.floor(iy)
    tx = ix - ix0
    ty = iy - iy0

    ix0i = jnp.clip(ix0, 0.0, W - 1).astype(jnp.int32)
    ix1i = jnp.clip(ix0 + 1.0, 0.0, W - 1).astype(jnp.int32)
    iy0i = jnp.clip(iy0, 0.0, H - 1).astype(jnp.int32)
    iy1i = jnp.clip(iy0 + 1.0, 0.0, H - 1).astype(jnp.int32)

    w00 = (1.0 - tx) * (1.0 - ty)
    w01 = tx * (1.0 - ty)
    w10 = (1.0 - tx) * ty
    w11 = tx * ty
    return (ix0i, ix1i, iy0i, iy1i), (w00, w01, w10, w11)


def _grid_sample_kernel(tbl_ref, cnt_ref, idx_ref, w_ref, x_ref, o_ref, *scratch,
                        C, TK, TP, use_acc_scratch):
    # tbl_ref: (N, NP, NK) i32 SMEM  compacted active K-chunk indices (padded
    #                                 by repeating the last active chunk)
    # cnt_ref: (N, NP)     i32 SMEM  number of active chunks per (batch, P-tile)
    # idx_ref: (1, 4, TP)  i32 VMEM  flattened corner indices for this P tile
    # w_ref:   (1, 4, TP)      VMEM  bilinear weights (f32 or bf16)
    # x_ref:   (1, C, TK)      VMEM  active K-chunk of the flattened input
    # o_ref:   (1, C, TP)      VMEM  output block (resident across the K axis)
    # scratch: optional (C, TP) f32 accumulator (only for non-f32 outputs)
    b = pl.program_id(0)
    p = pl.program_id(1)
    k = pl.program_id(2)

    def write_acc(v):
        if use_acc_scratch:
            scratch[0][...] = v
        else:
            o_ref[0] = v

    def read_acc():
        if use_acc_scratch:
            return scratch[0][...]
        return o_ref[0]

    @pl.when(k == 0)
    def _init():
        write_acc(jnp.zeros((C, TP), dtype=jnp.float32))

    # Only active chunks do work; padded tail iterations also keep the same
    # x block index (see index_map), so their DMA is elided as well.
    @pl.when(k < cnt_ref[b, p])
    def _compute():
        k0 = tbl_ref[b, p, k] * TK
        rel = idx_ref[0] - k0                      # (4, TP) chunk-local corner rows
        w = w_ref[0]                               # (4, TP)
        zero = jnp.zeros((), dtype=w.dtype)
        iota = lax.broadcasted_iota(jnp.int32, (TK, TP), 0)   # chunk-local, no +k0
        # One-hot-per-corner scaled by the bilinear weight; coincident corners
        # sum their weights (matches gather-and-accumulate semantics).
        S = (jnp.where(iota == rel[0:1, :], w[0:1, :], zero)
             + jnp.where(iota == rel[1:2, :], w[1:2, :], zero)
             + jnp.where(iota == rel[2:3, :], w[2:3, :], zero)
             + jnp.where(iota == rel[3:4, :], w[3:4, :], zero))
        x_chunk = x_ref[0]                         # (C, TK), native dtype (no upcast)
        if x_chunk.dtype != S.dtype:
            x_chunk = x_chunk.astype(S.dtype)
        write_acc(read_acc()
                  + jnp.dot(x_chunk, S, preferred_element_type=jnp.float32))

    if use_acc_scratch:
        @pl.when(k == pl.num_programs(2) - 1)
        def _finalize():
            o_ref[0] = scratch[0][...].astype(o_ref.dtype)


def grid_sample_bilinear_reflection(x, grid, *, k_chunk=512, p_chunk=1024):
    """Pallas equivalent of F.grid_sample(x, grid, 'bilinear', 'reflection', True)."""
    N, C, H, W = x.shape
    Ng, Ho, Wo, two = grid.shape
    assert two == 2 and Ng == N

    K = H * W
    P = Ho * Wo

    # Lane-dense tiles (multiples of 128) — fixes the TK alignment issue.
    TK = min(_round_up(k_chunk, 128), _round_up(K, 128))
    TP = min(_round_up(p_chunk, 128), _round_up(P, 128))
    Kp = _round_up(K, TK)
    Pp = _round_up(P, TP)
    NK = Kp // TK
    NP = Pp // TP
    Cp = _round_up(C, 8)                 # sublane-aligned channel dim

    out_dtype = x.dtype
    use_acc_scratch = (out_dtype != jnp.float32)
    w_dtype = jnp.float32 if x.dtype == jnp.float32 else jnp.bfloat16

    # ---- wrapper-side coordinate math (once per output pixel) ----
    gx = grid[..., 0].reshape(N, P).astype(jnp.float32)
    gy = grid[..., 1].reshape(N, P).astype(jnp.float32)
    (ix0, ix1, iy0, iy1), (w00, w01, w10, w11) = _bilinear_coords(gx, gy, H, W)
    idx = jnp.stack([iy0 * W + ix0, iy0 * W + ix1,
                     iy1 * W + ix0, iy1 * W + ix1], axis=1)          # (N, 4, P) i32
    wts = jnp.stack([w00, w01, w10, w11], axis=1).astype(w_dtype)    # (N, 4, P)
    if Pp != P:
        # Padded pixels: idx=0 (valid), weight=0 -> contribute nothing.
        idx = jnp.pad(idx, ((0, 0), (0, 0), (0, Pp - P)))
        wts = jnp.pad(wts, ((0, 0), (0, 0), (0, Pp - P)))

    # ---- active K-chunk table per (batch, P-tile) for scalar prefetch ----
    chunk_ids = (idx // TK).reshape(N, 4, NP, TP)
    n_ix = jnp.broadcast_to(jnp.arange(N).reshape(N, 1, 1, 1), chunk_ids.shape)
    p_ix = jnp.broadcast_to(jnp.arange(NP).reshape(1, 1, NP, 1), chunk_ids.shape)
    hits = jnp.zeros((N, NP, NK), jnp.int32).at[n_ix, p_ix, chunk_ids].add(1)
    active = hits > 0                                                 # (N, NP, NK)
    count = active.sum(-1).astype(jnp.int32)                          # (N, NP), >= 1
    order = jnp.argsort(jnp.where(active, 0, 1), axis=-1).astype(jnp.int32)
    j = jnp.arange(NK, dtype=jnp.int32).reshape(1, 1, NK)
    jc = jnp.minimum(j, count[..., None] - 1)       # repeat last active chunk in tail
    chunk_tbl = jnp.take_along_axis(order, jc, axis=-1).astype(jnp.int32)

    # ---- input layout plumbing (wrapper-side, lane-dense slabs) ----
    xf = x.reshape(N, C, K)
    xf = jnp.pad(xf, ((0, 0), (0, Cp - C), (0, Kp - K)))

    # ---- VMEM budget / scoped limit ----
    x_item = jnp.dtype(x.dtype).itemsize
    w_item = jnp.dtype(w_dtype).itemsize
    vmem_bytes = (2 * Cp * TK * x_item                 # x blocks (double-buffered)
                  + 2 * 4 * TP * 4                     # idx blocks
                  + 2 * 4 * TP * w_item                # weight blocks
                  + 2 * Cp * TP * x_item               # output blocks
                  + (Cp * TP * 4 if use_acc_scratch else 0)
                  + TK * TP * (4 + w_item))            # iota + S temporaries
    vmem_limit = int(min(max(2 * vmem_bytes, 32 * 1024 * 1024), 64 * 1024 * 1024))

    kernel = functools.partial(_grid_sample_kernel, C=Cp, TK=TK, TP=TP,
                               use_acc_scratch=use_acc_scratch)
    scratch_shapes = ([pltpu.VMEM((Cp, TP), jnp.float32)] if use_acc_scratch else [])

    out = pl.pallas_call(
        kernel,
        out_shape=jax.ShapeDtypeStruct((N, Cp, Pp), out_dtype),
        grid_spec=pltpu.PrefetchScalarGridSpec(
            num_scalar_prefetch=2,
            grid=(N, NP, NK),                          # K (reduction) last
            in_specs=[
                pl.BlockSpec((1, 4, TP), lambda b, p, k, tbl, cnt: (b, 0, p)),
                pl.BlockSpec((1, 4, TP), lambda b, p, k, tbl, cnt: (b, 0, p)),
                pl.BlockSpec((1, Cp, TK),
                             lambda b, p, k, tbl, cnt: (b, 0, tbl[b, p, k])),
            ],
            out_specs=pl.BlockSpec((1, Cp, TP), lambda b, p, k, tbl, cnt: (b, 0, p)),
            scratch_shapes=scratch_shapes,
        ),
        compiler_params=pltpu.CompilerParams(
            dimension_semantics=("parallel", "parallel", "arbitrary"),
            vmem_limit_bytes=vmem_limit),
    )(chunk_tbl, count, idx, wts, xf)

    # Strip C / P padding and restore NCHW.
    return out[:, :C, :P].reshape(N, C, Ho, Wo)


def _reference(x, grid):
    """Pure-JAX reference (same math, fancy-indexed gather) for validation."""
    N, C, H, W = x.shape
    _, Ho, Wo, _ = grid.shape
    outs = []
    for n in range(N):
        gx = grid[n, ..., 0].astype(jnp.float32)
        gy = grid[n, ..., 1].astype(jnp.float32)
        (ix0, ix1, iy0, iy1), (w00, w01, w10, w11) = _bilinear_coords(gx, gy, H, W)
        xf = x[n].reshape(C, H * W).astype(jnp.float32)
        v00 = xf[:, iy0 * W + ix0]
        v01 = xf[:, iy0 * W + ix1]
        v10 = xf[:, iy1 * W + ix0]
        v11 = xf[:, iy1 * W + ix1]
        o = v00 * w00 + v01 * w01 + v10 * w10 + v11 * w11
        outs.append(o)
    return jnp.stack(outs).astype(x.dtype)


if __name__ == "__main__":
    key = jax.random.PRNGKey(0)
    k1, k2, k3, k4 = jax.random.split(key, 4)

    # --- test 1: small shapes matching the module spec (f32) ---
    N, C, H, W = 2, 4, 16, 16
    Ho, Wo = 8, 8
    x = jax.random.normal(k1, (N, C, H, W), dtype=jnp.float32)
    # Sampling grid partially outside [-1, 1] to exercise reflection padding.
    grid = jax.random.uniform(k2, (N, Ho, Wo, 2), dtype=jnp.float32,
                              minval=-1.5, maxval=1.5)
    out = jax.block_until_ready(grid_sample_bilinear_reflection(x, grid))
    ref = jax.block_until_ready(_reference(x, grid))
    assert out.shape == (N, C, Ho, Wo)
    assert jnp.allclose(out, ref, atol=1e-5, rtol=1e-5)

    # --- test 2: odd C, multiple K chunks and P tiles (f32) ---
    N2, C2, H2, W2 = 1, 3, 48, 48
    Ho2, Wo2 = 40, 40
    x2 = jax.random.normal(k3, (N2, C2, H2, W2), dtype=jnp.float32)
    grid2 = jax.random.uniform(k4, (N2, Ho2, Wo2, 2), dtype=jnp.float32,
                               minval=-1.2, maxval=1.2)
    out2 = jax.block_until_ready(grid_sample_bilinear_reflection(x2, grid2))
    ref2 = jax.block_until_ready(_reference(x2, grid2))
    assert out2.shape == (N2, C2, Ho2, Wo2)
    assert jnp.allclose(out2, ref2, atol=1e-4, rtol=1e-4)

    # --- test 3: bf16 input path (bf16 MXU operands, f32 accumulator scratch) ---
    x_bf = x.astype(jnp.bfloat16)
    out_bf = jax.block_until_ready(grid_sample_bilinear_reflection(x_bf, grid))
    ref_bf = jax.block_until_ready(_reference(x_bf, grid))
    assert out_bf.shape == (N, C, Ho, Wo)
    assert jnp.allclose(out_bf.astype(jnp.float32), ref_bf.astype(jnp.float32),
                        atol=3e-2, rtol=3e-2)

    print("KERNEL_OK")
</pallas_src>

<mosaic_0001>
module attributes {stable_mosaic.version = 11 : i64} {
  func.func @_grid_sample_kernel(%arg0: i32, %arg1: i32, %arg2: i32, %arg3: memref<2x1x1xi32, #tpu.memory_space<smem>>, %arg4: memref<2x1xi32, #tpu.memory_space<smem>>, %arg5: memref<1x4x128xi32, #tpu.memory_space<vmem>>, %arg6: memref<1x4x128xf32, #tpu.memory_space<vmem>>, %arg7: memref<1x8x256xf32, #tpu.memory_space<vmem>>, %arg8: memref<1x8x128xf32, #tpu.memory_space<vmem>>) attributes {dimension_semantics = [#tpu.dimension_semantics<parallel>, #tpu.dimension_semantics<parallel>, #tpu.dimension_semantics<arbitrary>], iteration_bounds = array<i64: 2, 1, 1>, scalar_prefetch = 2 : i64, scratch_operands = 0 : i64, tpu.core_type = #tpu.core_type<tc>, window_params = [{transform_indices = @transform_0, window_bounds = array<i64: 1, 4, 128>}, {transform_indices = @transform_1, window_bounds = array<i64: 1, 4, 128>}, {transform_indices = @transform_2, window_bounds = array<i64: 1, 8, 256>}, {transform_indices = @transform_3, window_bounds = array<i64: 1, 8, 128>}]} {
    %c0_i32 = arith.constant 0 : i32
    %0 = arith.cmpi eq, %arg2, %c0_i32 : i32
    %1 = arith.extui %0 : i1 to i32
    %c0_i32_0 = arith.constant 0 : i32
    %2 = arith.cmpi ne, %1, %c0_i32_0 : i32
    scf.if %2 {
      %cst = arith.constant 0.000000e+00 : f32
      %9 = vector.broadcast %cst : f32 to vector<8x128xf32>
      %c0 = arith.constant 0 : index
      %c0_2 = arith.constant 0 : index
      %c0_3 = arith.constant 0 : index
      %10 = vector.load %arg8[%c0, %c0_2, %c0_3] : memref<1x8x128xf32, #tpu.memory_space<vmem>>, vector<1x8x128xf32>
      %11 = vector.shape_cast %10 : vector<1x8x128xf32> to vector<8x128xf32>
      %12 = vector.shape_cast %9 : vector<8x128xf32> to vector<1x8x128xf32>
      tpu.vector_store %arg8[%c0, %c0_2, %c0_3], %12 {strides = array<i32>} : memref<1x8x128xf32, #tpu.memory_space<vmem>>, vector<1x8x128xf32>,
    } else {
    }
    %3 = arith.index_cast %arg0 : i32 to index
    %4 = arith.index_cast %arg1 : i32 to index
    %5 = memref.load %arg4[%3, %4] : memref<2x1xi32, #tpu.memory_space<smem>>
    %6 = arith.cmpi slt, %arg2, %5 : i32
    %7 = arith.extui %6 : i1 to i32
    %c0_i32_1 = arith.constant 0 : i32
    %8 = arith.cmpi ne, %7, %c0_i32_1 : i32
    scf.if %8 {
      %9 = arith.index_cast %arg0 : i32 to index
      %10 = arith.index_cast %arg1 : i32 to index
      %11 = arith.index_cast %arg2 : i32 to index
      %12 = memref.load %arg3[%9, %10, %11] : memref<2x1x1xi32, #tpu.memory_space<smem>>
      %c256_i32 = arith.constant 256 : i32
      %13 = arith.muli %12, %c256_i32 : i32
      %c0 = arith.constant 0 : index
      %c0_2 = arith.constant 0 : index
      %c0_3 = arith.constant 0 : index
      %14 = vector.load %arg5[%c0, %c0_2, %c0_3] : memref<1x4x128xi32, #tpu.memory_space<vmem>>, vector<1x4x128xi32>
      %15 = vector.shape_cast %14 : vector<1x4x128xi32> to vector<4x128xi32>
      %16 = vector.broadcast %13 : i32 to vector<4x128xi32>
      %17 = arith.subi %15, %16 : vector<4x128xi32>
      %c0_4 = arith.constant 0 : index
      %c0_5 = arith.constant 0 : index
      %c0_6 = arith.constant 0 : index
      %18 = vector.load %arg6[%c0_4, %c0_5, %c0_6] : memref<1x4x128xf32, #tpu.memory_space<vmem>>, vector<1x4x128xf32>
      %19 = vector.shape_cast %18 : vector<1x4x128xf32> to vector<4x128xf32>
      %20 = tpu.iota {dimensions = array<i32: 0>} : vector<256x128xi32>
      %21 = vector.extract_strided_slice %17 {offsets = [0, 0], sizes = [1, 128], strides = [1, 1]} : vector<4x128xi32> to vector<1x128xi32>
      %22 = vector.broadcast %21 : vector<1x128xi32> to vector<256x128xi32>
      %23 = arith.cmpi eq, %20, %22 : vector<256x128xi32>
      %24 = vector.extract_strided_slice %19 {offsets = [0, 0], sizes = [1, 128], strides = [1, 1]} : vector<4x128xf32> to vector<1x128xf32>
      %cst = arith.constant 0.000000e+00 : f32
      %25 = vector.shape_cast %24 : vector<1x128xf32> to vector<1x128xf32>
      %26 = vector.broadcast %25 : vector<1x128xf32> to vector<256x128xf32>
      %27 = vector.broadcast %cst : f32 to vector<256x128xf32>
      %28 = arith.select %23, %26, %27 : vector<256x128xi1>, vector<256x128xf32>
      %29 = vector.extract_strided_slice %17 {offsets = [1, 0], sizes = [1, 128], strides = [1, 1]} : vector<4x128xi32> to vector<1x128xi32>
      %30 = vector.broadcast %29 : vector<1x128xi32> to vector<256x128xi32>
      %31 = arith.cmpi eq, %20, %30 : vector<256x128xi32>
      %32 = vector.extract_strided_slice %19 {offsets = [1, 0], sizes = [1, 128], strides = [1, 1]} : vector<4x128xf32> to vector<1x128xf32>
      %cst_7 = arith.constant 0.000000e+00 : f32
      %33 = vector.shape_cast %32 : vector<1x128xf32> to vector<1x128xf32>
      %34 = vector.broadcast %33 : vector<1x128xf32> to vector<256x128xf32>
      %35 = vector.broadcast %cst_7 : f32 to vector<256x128xf32>
      %36 = arith.select %31, %34, %35 : vector<256x128xi1>, vector<256x128xf32>
      %37 = arith.addf %28, %36 : vector<256x128xf32>
      %38 = vector.extract_strided_slice %17 {offsets = [2, 0], sizes = [1, 128], strides = [1, 1]} : vector<4x128xi32> to vector<1x128xi32>
      %39 = vector.broadcast %38 : vector<1x128xi32> to vector<256x128xi32>
      %40 = arith.cmpi eq, %20, %39 : vector<256x128xi32>
      %41 = vector.extract_strided_slice %19 {offsets = [2, 0], sizes = [1, 128], strides = [1, 1]} : vector<4x128xf32> to vector<1x128xf32>
      %cst_8 = arith.constant 0.000000e+00 : f32
      %42 = vector.shape_cast %41 : vector<1x128xf32> to vector<1x128xf32>
      %43 = vector.broadcast %42 : vector<1x128xf32> to vector<256x128xf32>
      %44 = vector.broadcast %cst_8 : f32 to vector<256x128xf32>
      %45 = arith.select %40, %43, %44 : vector<256x128xi1>, vector<256x128xf32>
      %46 = arith.addf %37, %45 : vector<256x128xf32>
      %47 = vector.extract_strided_slice %17 {offsets = [3, 0], sizes = [1, 128], strides = [1, 1]} : vector<4x128xi32> to vector<1x128xi32>
      %48 = vector.broadcast %47 : vector<1x128xi32> to vector<256x128xi32>
      %49 = arith.cmpi eq, %20, %48 : vector<256x128xi32>
      %50 = vector.extract_strided_slice %19 {offsets = [3, 0], sizes = [1, 128], strides = [1, 1]} : vector<4x128xf32> to vector<1x128xf32>
      %cst_9 = arith.constant 0.000000e+00 : f32
      %51 = vector.shape_cast %50 : vector<1x128xf32> to vector<1x128xf32>
      %52 = vector.broadcast %51 : vector<1x128xf32> to vector<256x128xf32>
      %53 = vector.broadcast %cst_9 : f32 to vector<256x128xf32>
      %54 = arith.select %49, %52, %53 : vector<256x128xi1>, vector<256x128xf32>
      %55 = arith.addf %46, %54 : vector<256x128xf32>
      %c0_10 = arith.constant 0 : index
      %c0_11 = arith.constant 0 : index
      %c0_12 = arith.constant 0 : index
      %56 = vector.load %arg7[%c0_10, %c0_11, %c0_12] : memref<1x8x256xf32, #tpu.memory_space<vmem>>, vector<1x8x256xf32>
      %57 = vector.shape_cast %56 : vector<1x8x256xf32> to vector<8x256xf32>
      %c0_13 = arith.constant 0 : index
      %c0_14 = arith.constant 0 : index
      %c0_15 = arith.constant 0 : index
      %58 = vector.load %arg8[%c0_13, %c0_14, %c0_15] : memref<1x8x128xf32, #tpu.memory_space<vmem>>, vector<1x8x128xf32>
      %59 = vector.shape_cast %58 : vector<1x8x128xf32> to vector<8x128xf32>
      %cst_16 = arith.constant dense<0.000000e+00> : vector<8x128xf32>
      %60 = tpu.matmul %57, %55, %cst_16 {dimension_numbers = #tpu.dot_dimension_numbers<[1], [0], [0], [1], [0, 0, 1, 1], [], []>} : vector<8x256xf32>, vector<256x128xf32>, vector<8x128xf32> -> vector<8x128xf32>
      %61 = arith.addf %59, %60 : vector<8x128xf32>
      %c0_17 = arith.constant 0 : index
      %c0_18 = arith.constant 0 : index
      %c0_19 = arith.constant 0 : index
      %62 = vector.load %arg8[%c0_17, %c0_18, %c0_19] : memref<1x8x128xf32, #tpu.memory_space<vmem>>, vector<1x8x128xf32>
      %63 = vector.shape_cast %62 : vector<1x8x128xf32> to vector<8x128xf32>
      %64 = vector.shape_cast %61 : vector<8x128xf32> to vector<1x8x128xf32>
      tpu.vector_store %arg8[%c0_17, %c0_18, %c0_19], %64 {strides = array<i32>} : memref<1x8x128xf32, #tpu.memory_space<vmem>>, vector<1x8x128xf32>,
    } else {
    }
    return
  }
  func.func @transform_0(%arg0: i32, %arg1: i32, %arg2: i32, %arg3: memref<2x1x1xi32, #tpu.memory_space<smem>>, %arg4: memref<2x1xi32, #tpu.memory_space<smem>>) -> (i32, i32, i32) {
    %c0_i32 = arith.constant 0 : i32
    %c0_i32_0 = arith.constant 0 : i32
    return %arg0, %c0_i32, %arg1 : i32, i32, i32
  }
  func.func @transform_1(%arg0: i32, %arg1: i32, %arg2: i32, %arg3: memref<2x1x1xi32, #tpu.memory_space<smem>>, %arg4: memref<2x1xi32, #tpu.memory_space<smem>>) -> (i32, i32, i32) {
    %c0_i32 = arith.constant 0 : i32
    %c0_i32_0 = arith.constant 0 : i32
    return %arg0, %c0_i32, %arg1 : i32, i32, i32
  }
  func.func @transform_2(%arg0: i32, %arg1: i32, %arg2: i32, %arg3: memref<2x1x1xi32, #tpu.memory_space<smem>>, %arg4: memref<2x1xi32, #tpu.memory_space<smem>>) -> (i32, i32, i32) {
    %0 = arith.index_cast %arg0 : i32 to index
    %1 = arith.index_cast %arg1 : i32 to index
    %2 = arith.index_cast %arg2 : i32 to index
    %3 = memref.load %arg3[%0, %1, %2] : memref<2x1x1xi32, #tpu.memory_space<smem>>
    %c0_i32 = arith.constant 0 : i32
    %c0_i32_0 = arith.constant 0 : i32
    return %arg0, %c0_i32, %3 : i32, i32, i32
  }
  func.func @transform_3(%arg0: i32, %arg1: i32, %arg2: i32, %arg3: memref<2x1x1xi32, #tpu.memory_space<smem>>, %arg4: memref<2x1xi32, #tpu.memory_space<smem>>) -> (i32, i32, i32) {
    %c0_i32 = arith.constant 0 : i32
    %c0_i32_0 = arith.constant 0 : i32
    return %arg0, %c0_i32, %arg1 : i32, i32, i32
  }
}

</mosaic_0001>

<bundles_post_ra>
// kernel: tpu_custom_call.1
= control target key start
LH: loop header
LB: loop body
LE: loop exit
PB: predicated region body
PF: predicated region fallthrough
CT: control target
= control target key end

     0   :  { %s2059_s0 = inlined_call_operand.vmem [shape: s32[2,1,1], index: 0, kind: input, shape index: {}]   ;;  %s2060_s2 = inlined_call_operand.vmem [shape: s32[2,4,128], index: 2, kind: input, shape index: {}]   ;;  %s2061_s3 = inlined_call_operand.hbm [shape: f32[2,4,128], index: 3, kind: input, shape index: {}]   ;;  %s2062_s4 = inlined_call_operand.hbm [shape: f32[2,8,256], index: 4, kind: input, shape index: {}]   ;;  %s2063_s5 = inlined_call_operand.hbm [shape: f32[2,8,128], index: 5, kind: output, shape index: {}]   ;;  %s2064_s1 = inlined_call_operand.vmem [shape: s32[2,1], index: 1, kind: input, shape index: {}]  }
   0x1   :  { %2074 = sst [smem:[#allocation22_spill]] %s2061_s3  ;;  %s10_s20 = sshll.u32 %s2059_s0, 4  ;;  %s11_s20 = int_to_ptr.vmem [resolvable:$true] %s10_s20 }
   0x2   :  { %s14_s23 = sshll.u32 %s2064_s1, 4  ;;  %s1151_s24 = scalar_lea.vmem %s11_s20, 32  ;;  %s15_s23 = int_to_ptr.vmem [resolvable:$true] %s14_s23 }
   0x3   :  { %p1152_p0 = scmp.ne.s32.totalorder %s11_s20, %s1151_s24  ;;  %p1156_p1 = scmp.lt.s32.totalorder %s11_s20, %s11_s20 }
   0x4   :  { %p1157_p2 = scmp.lt.s32.totalorder %s1151_s24, %s1151_s24 }
   0x6   :  { %p1158_p3 = por %p1157_p2, %p1156_p1 }
   0x8   :  { %p1159_p4 = pnand %p1158_p3, %p1152_p0 }
   0xa   :  { %1162 = shalt.err (!%p1159_p4)  }
   0xb   :  { %s1343_s25 = smov [#allocation3]   ;;  %s1163_s26 = scalar_lea.vmem %s15_s23, 32 }
   0xc   :  { %13 = dma.vmem_to_smem %s11_s20, 32, %s1343_s25, [#allocation2] }
   0xd   :  { %p1164_p5 = scmp.ne.s32.totalorder %s15_s23, %s1163_s26  ;;  %p1168_p6 = scmp.lt.s32.totalorder %s15_s23, %s15_s23 }
   0xe   :  { %p1169_p7 = scmp.lt.s32.totalorder %s1163_s26, %s1163_s26 }
  0x10   :  { %p1170_p8 = por %p1169_p7, %p1168_p6 }
  0x12   :  { %p1171_p9 = pnand %p1170_p8, %p1164_p5 }
  0x14   :  { %1174 = shalt.err (!%p1171_p9)  }
  0x15   :  { %s1344_s0 = smov [#allocation4]  }
  0x16   :  { %17 = dma.vmem_to_smem %s15_s23, 32, %s1344_s0, [#allocation2] }
  0x17   :  { %1293 = dma.done.wait [#allocation2], 64 }
  0x18   :  { %1294 = vsyncadd [#allocation2], 4294967232 }
  0x19   :  { %19 = sfence }
  0x1a   :  { %20 = vsyncpa [#allocation6], 0 }
  0x1b   :  { %22 = vsyncpa [#allocation6 + $0x1], 0 }
  0x1c   :  { %23 = vsyncpa [#allocation9], 0 }
  0x1d   :  { %25 = vsyncpa [#allocation9 + $0x1], 0 }
  0x1e   :  { %26 = vsyncpa [#allocation7], 0 }
  0x1f   :  { %28 = vsyncpa [#allocation7 + $0x1], 0  ;;  %s1385_s1 = smov 0   ;;  %s1387_s27 = smov 0  }
  0x20   :  { %s1389_s28 = smov 0   ;;  %s1391_s29 = smov 0  }
  0x21   :  { %s1393_s30 = smov 0   ;;  %s1395_s6 = smov 0  }
  0x22   :  { %s1397_s7 = smov 0   ;;  %s1399_s8 = smov 0  }
  0x23   :  { %s1401_s9 = smov 0  }
  0x24 LB: > { %2075 = sst [smem:[#allocation17_spill]] %s1321_s29  ;;  %s991_s10 = sadd.s32 4294967295, %s1341_s9   ;;  %s1341_s9 = sphi %s1401_s9, %s34_s9   ;;  %s1337_s8 = sphi %s1399_s8, %s2112_s8   ;;  %s1333_s7 = sphi %s1397_s7, %s2111_s7   ;;  %s1329_s6 = sphi %s1395_s6, %s2104_s6   ;;  %s1325_s30 = sphi %s1393_s30, %s2110_s30   ;;  %s1321_s29 = sphi %s1391_s29, %s2109_s29   ;;  %s1317_s28 = sphi %s1389_s28, %s2108_s28   ;;  %s1313_s27 = sphi %s1387_s27, %s2107_s27   ;;  %s1309_s1 = sphi %s1385_s1, %s2106_s1  }
  0x25   : > { %2076 = sst [smem:[#allocation18_spill]] %s1329_s6  ;;  %s992_s11 = sadd.s32 4294967294, %s1341_s9  }
  0x26   : > { %s53_s12 = sadd.s32 1, %s1337_s8  ;;  %s90_s13 = sadd.s32 1, %s1329_s6 }
  0x27   : > { %p55_p10 = scmp.ge.s32.totalorder %s53_s12, 2  ;;  %p97_p11 = scmp.ne.s32.totalorder %s1329_s6, %s1325_s30 }
  0x28   : > { %p2066_p12 = scmp.eq.s32.totalorder %s1341_s9, 0  ;;  %p103_p13 = scmp.ne.s32.totalorder %s1325_s30, %s1321_s29 }
  0x29   : > { %s2114_s12 = smov (%p55_p10, %s53_s12), 0  ;;  %p1450_p1 = scmp.eq.s32.totalorder %s991_s10, 0 }
  0x2a   : > { %2077 = sst [smem:[#allocation19_spill]] %s2114_s12  ;;  %p1446_p0 = por %p2066_p12, %p97_p11 }
  0x2b   : > { %s1456_s16 = ssub.s32 %s1337_s8, %s2114_s12  ;;  %s994_s17 = sshll.u32 %s2114_s12, 7 }
  0x2c   : > { %p88_p2 = scmp.eq.s32.totalorder %s1456_s16, 0  ;;  %p1465_p3 = por %p1450_p1, %p103_p13 }
  0x2d   : > { %s1469_s19 = sld [smem:[#allocation3 + %s994_s17]]  ;;  %p175_p4 = scmp.eq.s32.totalorder %s991_s10, 1 }
  0x2e   : > { %s2080_s18 = scalar_select %p1465_p3, 1, 0 }
  0x2f   : > { %s1472_s20 = scalar_select %p88_p2, %s1329_s6, %s90_s13  }
  0x30   : > { %p1477_p5 = por %p175_p4, %p97_p11  ;;  %p181_p6 = scmp.eq.s32.totalorder %s992_s11, 1 }
  0x31   : > { %2081 = sst [smem:[#allocation20_spill]] %s1472_s20  ;;  %p2067_p8 = scmp.lt.s32.totalorder %s1341_s9, 2 }
  0x32   : > { %s2082_s21 = scalar_select %p1477_p5, 1, 0 }
  0x33   : > { %p1486_p9 = por %p181_p6, %p103_p13  ;;  %s211_s23 = sand.u32 1, %s1329_s6  }
  0x34   : > { %s997_s24 = sshll.u32 %s211_s23, 2  ;;  %s998_s25 = sshll.u32 %s1337_s8, 6 }
  0x35   : > { %s2083_s22 = scalar_select %p1486_p9, 1, 0 }
  0x36   : > { %s2085_s3 = sld [smem:[#allocation22_spill]]  ;;  %s215_s13 = scalar_lea.vmem [#allocation5], %s997_s24 }
  0x37   : > { %2084 = sst [smem:[#allocation21_spill]] %s2083_s22  ;;  %s223_s17 = sshll.u32 %s215_s13, 4  ;;  %s224_s17 = int_to_ptr.vmem [resolvable:$true] %s223_s17 }
  0x38   : > { %p1499_p10 = pnand %p2067_p8, %p1446_p0  ;;  %p1004_p11 = scmp.ge.s32.totalorder %s1341_s9, 1 }
  0x39   : > { %p258_p13 = scmp.lt.s32.totalorder %s1341_s9, 3  ;;  %s212_s12 = scalar_lea.sflag [#allocation6], %s211_s23 }
  0x3a   : > { %p1177_p2 = pneg %p1499_p10  ;;  %s1188_s20 = scalar_lea.vmem %s224_s17, 64 }
  0x3b   : > { %p1189_p4 = scmp.ne.s32.totalorder %s224_s17, %s1188_s20 }
  0x3c   : > { %s221_s10 = scalar_lea.hbm %s2085_s3, %s998_s25  ;;  %s1345_s25 = smov [#allocation5]  }
  0x3d   : > { %p1191_p6 = pnand %p1189_p4, %p1177_p2  ;;  %s1193_s24 = sshll.u32 %s1345_s25, 4  ;;  %s1194_s24 = int_to_ptr.vmem [resolvable:$false] %s1193_s24 }
  0x3e   : > { %s1195_s26 = scalar_lea.vmem %s1194_s24, 128  ;;  %p1196_p12 = scmp.lt.s32.totalorder %s224_s17, %s1194_s24 }
  0x3f   : > { %p1192_p7 = pneg %p1191_p6  ;;  %p1197_p9 = scmp.lt.s32.totalorder %s1195_s26, %s1188_s20 }
  0x41   : > { %p1198_p0 = por %p1197_p9, %p1196_p12 }
  0x43   : > { %p1199_p8 = pnand %p1198_p0, %p1192_p7 }
  0x45   : > { %1202 = shalt.err (!%p1199_p8)
}
  0x46   : > { %1064 = dma.hbm_to_vmem [thread:$0]  (!%p1499_p10), %s221_s10, 64, %s224_s17, %s212_s12  }
  0x47   : > { %p1513_p12 = pnand %p1004_p11, %p258_p13  ;;  %s993_s20 = sshll.u32 %s1337_s8, 7 }
  0x48   : > { %s121_s23 = sld [smem:[#allocation3 + %s993_s20]]  ;;  %p143_p7 = scmp.ne.s32.totalorder %s1317_s28, %s1313_s27 }
  0x49   : > { %s2087_s14 = scalar_select %p1513_p12, 1, 0 }
  0x4a   : > { %p149_p8 = scmp.ne.s32.totalorder %s1313_s27, %s1309_s1  ;;  %p2088_p9 = scmp.eq.s32.totalorder %s1341_s9, 0 }
  0x4b   : > { %s230_s12 = sand.u32 1, %s1317_s28   ;;  %s136_s17 = sadd.s32 1, %s1317_s28 }
  0x4c   : > { %p145_p2 = por %p143_p7, %p2088_p9  ;;  %p1526_p4 = por %p149_p8, %p1450_p1 }
  0x4d   : > { %s999_s25 = sshll.u32 %s230_s12, 4  ;;  %p2090_p11 = scmp.lt.s32.totalorder %s1341_s9, 2 }
  0x4e   : > { %s2089_s0 = scalar_select %p1526_p4, 1, 0 }
  0x4f   : > { %s1054_s10 = scalar_select %p145_p2, [#allocation3], [#allocation11] }
  0x50   : > { %s132_s13 = ssub.s32 %s121_s23, %s1469_s19  ;;  %p1536_p13 = pnand %p2090_p11, %p145_p2 }
  0x51   : > { %s133_s11 = sor.u32 %s132_s13, %s1456_s16  ;;  %s2116_s20 = smov (!%p145_p2, %s993_s20), 0 }
  0x52   : > { %p134_p10 = scmp.eq.s32.totalorder %s133_s11, 0  ;;  %p2092_p1 = pmov %p2090_p11 }
  0x53   : > { %s1002_s26 = sshll.u32 %s1337_s8, 1  ;;  %s234_s19 = scalar_lea.vmem [#allocation8], %s999_s25 }
  0x54   : > { %s1541_s1 = scalar_select %p134_p10, %s1317_s28, %s136_s17  }
  0x55   : > { %s2118_s10 = smov (!%p2092_p1, %s1054_s10), [#allocation12]  ;;  %p2093_p6 = pmov %p2092_p1 }
  0x56   : > { %s253_s23 = sshll.u32 %s234_s19, 4  ;;  %s231_s29 = scalar_lea.sflag [#allocation9], %s230_s12  ;;  %s1548_s23 = int_to_ptr.vmem [resolvable:$true] %s253_s23 }
  0x57   : > { %s2120_s20 = smov (!%p2093_p6, %s2116_s20), 0  ;;  %p1205_p7 = pneg %p1536_p13 }
  0x58   : > { %s243_s15 = sld [smem:[%s2118_s10 + %s2120_s20]]  ;;  %s1208_s25 = scalar_lea.hbm %s2062_s4, 512 }
  0x5e   : > { %s1001_s16 = sshll.u32 %s243_s15, 1 }
  0x5f   : > { %s249_s13 = sadd.s32 %s1002_s26, %s1001_s16 }
  0x60   : > { %s1003_s11 = sshll.u32 %s249_s13, 7 }
  0x61   : > { %s251_s22 = scalar_lea.hbm %s2062_s4, %s1003_s11 }
  0x62   : > { %s1203_s17 = scalar_lea.hbm %s251_s22, 256  ;;  %p1209_p2 = scmp.lt.s32.totalorder %s251_s22, %s2062_s4 }
  0x63   : > { %p1204_p0 = scmp.ne.s32.totalorder %s251_s22, %s1203_s17  ;;  %p1210_p10 = scmp.lt.s32.totalorder %s1208_s25, %s1203_s17 }
  0x65   : > { %p1206_p8 = pnand %p1205_p7, %p1204_p0  ;;  %p1211_p11 = por %p1210_p10, %p1209_p2 }
  0x67   : > { %p1207_p9 = pneg %p1206_p8 }
  0x69   : > { %p1212_p1 = pnand %p1211_p11, %p1207_p9 }
  0x6b   : > { %1215 = shalt.err (!%p1212_p1)
}
  0x6c   : > { %s1216_s3 = scalar_lea.vmem %s1548_s23, 256  ;;  %s1346_s6 = smov [#allocation8]  }
  0x6d   : > { %p1217_p6 = scmp.ne.s32.totalorder %s1548_s23, %s1216_s3  ;;  %s1221_s12 = sshll.u32 %s1346_s6, 4  ;;  %s1222_s12 = int_to_ptr.vmem [resolvable:$false] %s1221_s12 }
  0x6e   : > { %s1223_s19 = scalar_lea.vmem %s1222_s12, 512  ;;  %p1224_p8 = scmp.lt.s32.totalorder %s1548_s23, %s1222_s12 }
  0x6f   : > { %p1219_p5 = pnand %p1217_p6, %p1205_p7  ;;  %p1225_p4 = scmp.lt.s32.totalorder %s1223_s19, %s1216_s3 }
  0x71   : > { %p1220_p0 = pneg %p1219_p5  ;;  %p1226_p3 = por %p1225_p4, %p1224_p8 }
  0x73   : > { %p1227_p12 = pnand %p1226_p3, %p1220_p0 }
  0x75   : > { %1230 = shalt.err (!%p1227_p12)
}
  0x76   : > { %1069 = dma.hbm_to_vmem [thread:$0]  (!%p1536_p13), %s251_s22, 256, %s1548_s23, %s231_s29  }
  0x77   : > { %p2094_p9 = scmp.ne.s32.totalorder %s2087_s14, 0 }
  0x78   : > { %s1570_s16 = sand.u32 (!%p2094_p9), 1, %s1325_s30   ;;  %p2095_p5 = scmp.ne.s32.totalorder (!%p2094_p9), %s2080_s18, 0 }
  0x79   : > { %262 = sbr.rel (%p2094_p9) target bundleno = 476 (0x1dc), region = 32  ;;  %s1005_s13 = sshll.u32 (!%p2094_p9), %s1570_s16, 2 }
  0x7a   : > { %s265_s11 = scalar_lea.sflag (!%p2094_p9), [#allocation6], %s1570_s16  ;;  %s268_s17 = scalar_lea.vmem (!%p2094_p9), [#allocation5], %s1005_s13 }
  0x7e   : > { %1296 = dma.done.wait (%p2095_p5), %s265_s11, 64  }
  0x7f   : > { %1298 = vsyncadd (%p2095_p5), %s265_s11, 4294967232  ;;  %s273_s29 = sand.u32 1, %s1313_s27   ;;  %p2096_p3 = scmp.ne.s32.totalorder %s2089_s0, 0 }
  0x80   : > { %s1579_s22 = sshll.u32 %s273_s29, 4  ;;  %s274_s14 = scalar_lea.sflag [#allocation9], %s273_s29 }
  0x81   : > { %s277_s24 = scalar_lea.vmem [#allocation8], %s1579_s22 }
  0x82   : > { %1300 = dma.done.wait (%p2096_p3), %s274_s14, 256  }
  0x83   : > { %1302 = vsyncadd (%p2096_p3), %s274_s14, 4294967040  ;;  %s1587_s23 = sshll.u32 %s1333_s7, 7  ;;  %s1007_s18 = sshll.u32 %s1570_s16, 3  ;;  %v1347_v0 = vmov 0.0  }
  0x84   : > { %s341_s20 = sld [smem:[#allocation4 + %s1587_s23]]  ;;  %p312_p12 = scmp.lt.s32.totalorder %s1333_s7, 1 }
  0x85   : > { %s1592_s10 = scalar_lea.vmem [#allocation10], %s1007_s18 }
  0x86   : > { %333 = vst [vmem:[%s1592_s10] sm:$0xff] %v1347_v0  ;;  %s2122_s7 = smov (!%p312_p12, %s1333_s7), 1 }
  0x87   : > { %s1008_s25 = sshll.u32 %s2122_s7, 2 }
  0x88   : > { %s318_s26 = scalar_lea.vmem %s2060_s2, %s1008_s25 }
  0x8a   : > { %p1011_p4 = scmp.le.s32.totalorder %s341_s20, 0 }
  0x8b   : > { %s354_s3 = sld [smem:[#allocation3 + %s1587_s23]] (!%p1011_p4) }
  0x8c   : > { %345 = sbr.rel (%p1011_p4) target bundleno = 452 (0x1c4), region = 48 }
  0x91   : > { %v360_v1 = vlaneseq  ;;  %v778_v2 = vld [vmem:[%s277_s24 + $0x8] sm:$0xff]  ;;  %v356_v9 = vld [vmem:[%s318_s26] sm:$0xf]  ;;  %s1013_s7 = sshll.u32 %s354_s3, 8 }
  0x92   : > { %844 = vmatprep.mubr.f32.mxu0 %v778_v2  ;;  %v359_v4 = vld [vmem:[%s268_s17] sm:$0xf]  ;;  %v357_v18 = vstv %s1013_s7 }
  0x93   : > { %v1602_v3 = vshrl.u32 %v360_v1, 7  ;;  %v358_v22 = vsub.s32 %v356_v9, %v357_v18 }
  0x95   : > { %v392_v5 = vadd.s32 248, %v1602_v3  ;;  %v395_v6 = vsub.s32 0, %v1602_v3  ;;  %v467_v7 = vsub.s32 1, %v1602_v3  ;;  %v571_v8 = vsub.s32 2, %v1602_v3 }
  0x96   : > { %v675_v10 = vsub.s32 3, %v1602_v3  ;;  %v376_v11 = vadd.s32 120, %v1602_v3  ;;  %v391_v12 = vadd.s32 240, %v1602_v3  ;;  %v1612_v13 = vadd.s32 112, %v1602_v3 }
  0x97   : > { %v1614_v14 = vrot.slane %v359_v4, %v395_v6  ;;  %v1616_v15 = vrot.slane %v359_v4, %v467_v7  ;;  %v1618_v16 = vrot.slane %v359_v4, %v571_v8  ;;  %v1621_v17 = vadd.s32 232, %v1602_v3 }
  0x98   : > { %v1623_v19 = vrot.slane %v359_v4, %v675_v10  ;;  %v1626_v20 = vadd.s32 104, %v1602_v3  ;;  %v1629_v21 = vadd.s32 224, %v1602_v3  ;;  %v1632_v23 = vadd.s32 96, %v1602_v3 }
  0x99   : > { %v1635_v24 = vadd.s32 216, %v1602_v3  ;;  %v1638_v25 = vadd.s32 88, %v1602_v3  ;;  %v1641_v26 = vadd.s32 208, %v1602_v3  ;;  %v1644_v27 = vadd.s32 80, %v1602_v3 }
  0x9a   : > { %v1647_v28 = vadd.s32 200, %v1602_v3  ;;  %v1650_v29 = vadd.s32 72, %v1602_v3  ;;  %v1652_v30 = vrot.slane %v358_v22, %v395_v6  ;;  %v1654_v31 = vrot.slane %v358_v22, %v467_v7 }
  0x9b   : > { %v1656_v32 = vrot.slane %v358_v22, %v571_v8  ;;  %v1658_v33 = vrot.slane %v358_v22, %v675_v10  ;;  %v1661_v34 = vadd.s32 192, %v1602_v3  ;;  %v1664_v35 = vadd.s32 64, %v1602_v3 }
  0x9c   : > { %v1667_v36 = vadd.s32 184, %v1602_v3  ;;  %v1670_v37 = vadd.s32 56, %v1602_v3  ;;  %vm428_vm0 = vcmp.eq.s32.totalorder %v392_v5, %v1652_v30  ;;  %vm500_vm1 = vcmp.eq.s32.totalorder %v392_v5, %v1654_v31 }
  0x9d   : > { %vm604_vm2 = vcmp.eq.s32.totalorder %v392_v5, %v1656_v32  ;;  %vm708_vm3 = vcmp.eq.s32.totalorder %v392_v5, %v1658_v33  ;;  %v464_v38 = vsel %vm428_vm0, %v1614_v14, 0.0  ;;  %v536_v39 = vsel %vm500_vm1, %v1616_v15, 0.0 }
  0x9e   : > { %v640_v40 = vsel %vm604_vm2, %v1618_v16, 0.0  ;;  %v744_v41 = vsel %vm708_vm3, %v1623_v19, 0.0  ;;  %v568_v42 = vadd.f32 %v536_v39, %v464_v38  ;;  %vm412_vm4 = vcmp.eq.s32.totalorder %v376_v11, %v1652_v30 }
  0x9f   : > { %vm484_vm5 = vcmp.eq.s32.totalorder %v376_v11, %v1654_v31  ;;  %vm588_vm6 = vcmp.eq.s32.totalorder %v376_v11, %v1656_v32  ;;  %v448_v43 = vsel %vm412_vm4, %v1614_v14, 0.0  ;;  %vm692_vm7 = vcmp.eq.s32.totalorder %v376_v11, %v1658_v33 }
  0xa0   : > { %v520_v44 = vsel %vm484_vm5, %v1616_v15, 0.0  ;;  %v624_v45 = vsel %vm588_vm6, %v1618_v16, 0.0  ;;  %v672_v46 = vadd.f32 %v640_v40, %v568_v42  ;;  %v728_v48 = vsel %vm692_vm7, %v1623_v19, 0.0 }
  0xa1   : > { %v552_v47 = vadd.f32 %v520_v44, %v448_v43  ;;  %vm427_vm8 = vcmp.eq.s32.totalorder %v391_v12, %v1652_v30  ;;  %vm499_vm9 = vcmp.eq.s32.totalorder %v391_v12, %v1654_v31  ;;  %vm603_vm10 = vcmp.eq.s32.totalorder %v391_v12, %v1656_v32 }
  0xa2   : > { %v463_v49 = vsel %vm427_vm8, %v1614_v14, 0.0  ;;  %vm707_vm11 = vcmp.eq.s32.totalorder %v391_v12, %v1658_v33  ;;  %v776_v50 = vadd.f32 %v744_v41, %v672_v46  ;;  %v535_v52 = vsel %vm499_vm9, %v1616_v15, 0.0 }
  0xa3   : > { %v656_v51 = vadd.f32 %v624_v45, %v552_v47  ;;  %v639_v53 = vsel %vm603_vm10, %v1618_v16, 0.0  ;;  %v567_v54 = vadd.f32 %v535_v52, %v463_v49  ;;  %v743_v55 = vsel %vm707_vm11, %v1623_v19, 0.0 }
  0xa4   : > { %vm411_vm12 = vcmp.eq.s32.totalorder %v1612_v13, %v1652_v30  ;;  %vm483_vm13 = vcmp.eq.s32.totalorder %v1612_v13, %v1654_v31  ;;  %1018 = vmatprep.subr.mxu0 %v776_v50  ;;  %vm587_vm14 = vcmp.eq.s32.totalorder %v1612_v13, %v1656_v32  ;;  %vm691_vm15 = vcmp.eq.s32.totalorder %v1612_v13, %v1658_v33 }
  0xa5   : > { %v760_v56 = vadd.f32 %v728_v48, %v656_v51  ;;  %v447_v57 = vsel %vm411_vm12, %v1614_v14, 0.0  ;;  %v519_v58 = vsel %vm483_vm13, %v1616_v15, 0.0  ;;  %v671_v59 = vadd.f32 %v639_v53, %v567_v54 }
  0xa6   : > { %v551_v60 = vadd.f32 %v519_v58, %v447_v57  ;;  %v623_v61 = vsel %vm587_vm14, %v1618_v16, 0.0  ;;  %v727_v62 = vsel %vm691_vm15, %v1623_v19, 0.0  ;;  %vm426_vm0 = vcmp.eq.s32.totalorder %v1621_v17, %v1652_v30 }
  0xa7   : > { %1019 = vmatpush3.msra.mxu0 %v760_v56  ;;  %vm498_vm1 = vcmp.eq.s32.totalorder %v1621_v17, %v1654_v31  ;;  %vm602_vm2 = vcmp.eq.s32.totalorder %v1621_v17, %v1656_v32  ;;  %v775_v63 = vadd.f32 %v743_v55, %v671_v59  ;;  %v462_v1 = vsel %vm426_vm0, %v1614_v14, 0.0 }
  0xa8   : > { %v655_v0 = vadd.f32 %v623_v61, %v551_v60  ;;  %v534_v2 = vsel %vm498_vm1, %v1616_v15, 0.0  ;;  %v638_v5 = vsel %vm602_vm2, %v1618_v16, 0.0  ;;  %vm706_vm3 = vcmp.eq.s32.totalorder %v1621_v17, %v1658_v33 }
  0xa9   : > { %v566_v4 = vadd.f32 %v534_v2, %v462_v1  ;;  %vm410_vm4 = vcmp.eq.s32.totalorder %v1626_v20, %v1652_v30  ;;  %1020 = vmatprep.subr.mxu0 %v775_v63  ;;  %v742_v7 = vsel %vm706_vm3, %v1623_v19, 0.0  ;;  %vm482_vm5 = vcmp.eq.s32.totalorder %v1626_v20, %v1654_v31 }
  0xaa   : > { %v759_v6 = vadd.f32 %v727_v62, %v655_v0  ;;  %v446_v8 = vsel %vm410_vm4, %v1614_v14, 0.0  ;;  %v518_v10 = vsel %vm482_vm5, %v1616_v15, 0.0  ;;  %vm586_vm6 = vcmp.eq.s32.totalorder %v1626_v20, %v1656_v32 }
  0xab   : > { %v670_v9 = vadd.f32 %v638_v5, %v566_v4  ;;  %vm690_vm7 = vcmp.eq.s32.totalorder %v1626_v20, %v1658_v33  ;;  %v550_v11 = vadd.f32 %v518_v10, %v446_v8  ;;  %v622_v12 = vsel %vm586_vm6, %v1618_v16, 0.0 }
  0xac   : > { %1021 = vmatpush3.msra.mxu0 %v759_v6  ;;  %v726_v13 = vsel %vm690_vm7, %v1623_v19, 0.0  ;;  %vm425_vm8 = vcmp.eq.s32.totalorder %v1629_v21, %v1652_v30  ;;  %vm497_vm9 = vcmp.eq.s32.totalorder %v1629_v21, %v1654_v31  ;;  %vm601_vm10 = vcmp.eq.s32.totalorder %v1629_v21, %v1656_v32 }
  0xad   : > { %v774_v17 = vadd.f32 %v742_v7, %v670_v9  ;;  %v461_v18 = vsel %vm425_vm8, %v1614_v14, 0.0  ;;  %v654_v22 = vadd.f32 %v622_v12, %v550_v11  ;;  %v533_v20 = vsel %vm497_vm9, %v1616_v15, 0.0 }
  0xae   : > { %v637_v38 = vsel %vm601_vm10, %v1618_v16, 0.0  ;;  %vm705_vm11 = vcmp.eq.s32.totalorder %v1629_v21, %v1658_v33  ;;  %v565_v39 = vadd.f32 %v533_v20, %v461_v18  ;;  %vm409_vm12 = vcmp.eq.s32.totalorder %v1632_v23, %v1652_v30 }
  0xaf   : > { %1022 = vmatprep.subr.mxu0 %v774_v17  ;;  %v741_v40 = vsel %vm705_vm11, %v1623_v19, 0.0  ;;  %vm481_vm13 = vcmp.eq.s32.totalorder %v1632_v23, %v1654_v31  ;;  %v758_v41 = vadd.f32 %v726_v13, %v654_v22  ;;  %v445_v42 = vsel %vm409_vm12, %v1614_v14, 0.0 }
  0xb0   : > { %v517_v43 = vsel %vm481_vm13, %v1616_v15, 0.0  ;;  %vm585_vm14 = vcmp.eq.s32.totalorder %v1632_v23, %v1656_v32  ;;  %v669_v44 = vadd.f32 %v637_v38, %v565_v39  ;;  %vm689_vm15 = vcmp.eq.s32.totalorder %v1632_v23, %v1658_v33 }
  0xb1   : > { %v549_v21 = vadd.f32 %v517_v43, %v445_v42  ;;  %v621_v45 = vsel %vm585_vm14, %v1618_v16, 0.0  ;;  %1023 = vmatpush3.msra.mxu0 %v758_v41  ;;  %v725_v46 = vsel %vm689_vm15, %v1623_v19, 0.0  ;;  %vm424_vm0 = vcmp.eq.s32.totalorder %v1635_v24, %v1652_v30 }
  0xb2   : > { %vm496_vm1 = vcmp.eq.s32.totalorder %v1635_v24, %v1654_v31  ;;  %vm600_vm2 = vcmp.eq.s32.totalorder %v1635_v24, %v1656_v32  ;;  %v773_v47 = vadd.f32 %v741_v40, %v669_v44  ;;  %v460_v49 = vsel %vm424_vm0, %v1614_v14, 0.0 }
  0xb3   : > { %v653_v48 = vadd.f32 %v621_v45, %v549_v21  ;;  %v532_v50 = vsel %vm496_vm1, %v1616_v15, 0.0  ;;  %v636_v23 = vsel %vm600_vm2, %v1618_v16, 0.0  ;;  %vm704_vm3 = vcmp.eq.s32.totalorder %v1635_v24, %v1658_v33 }
  0xb4   : > { %v564_v51 = vadd.f32 %v532_v50, %v460_v49  ;;  %vm408_vm4 = vcmp.eq.s32.totalorder %v1638_v25, %v1652_v30  ;;  %1024 = vmatprep.subr.mxu0 %v773_v47  ;;  %v740_v53 = vsel %vm704_vm3, %v1623_v19, 0.0  ;;  %vm480_vm5 = vcmp.eq.s32.totalorder %v1638_v25, %v1654_v31 }
  0xb5   : > { %v757_v52 = vadd.f32 %v725_v46, %v653_v48  ;;  %v444_v54 = vsel %vm408_vm4, %v1614_v14, 0.0  ;;  %v516_v56 = vsel %vm480_vm5, %v1616_v15, 0.0  ;;  %vm584_vm6 = vcmp.eq.s32.totalorder %v1638_v25, %v1656_v32 }
  0xb6   : > { %v668_v55 = vadd.f32 %v636_v23, %v564_v51  ;;  %vm688_vm7 = vcmp.eq.s32.totalorder %v1638_v25, %v1658_v33  ;;  %v548_v24 = vadd.f32 %v516_v56, %v444_v54  ;;  %v620_v57 = vsel %vm584_vm6, %v1618_v16, 0.0 }
  0xb7   : > { %1025 = vmatpush3.msra.mxu0 %v757_v52  ;;  %v724_v58 = vsel %vm688_vm7, %v1623_v19, 0.0  ;;  %vm423_vm8 = vcmp.eq.s32.totalorder %v1641_v26, %v1652_v30  ;;  %vm495_vm9 = vcmp.eq.s32.totalorder %v1641_v26, %v1654_v31  ;;  %vm599_vm10 = vcmp.eq.s32.totalorder %v1641_v26, %v1656_v32 }
  0xb8   : > { %v772_v59 = vadd.f32 %v740_v53, %v668_v55  ;;  %v459_v60 = vsel %vm423_vm8, %v1614_v14, 0.0  ;;  %v652_v61 = vadd.f32 %v620_v57, %v548_v24  ;;  %v531_v25 = vsel %vm495_vm9, %v1616_v15, 0.0 }
  0xb9   : > { %v635_v62 = vsel %vm599_vm10, %v1618_v16, 0.0  ;;  %vm703_vm11 = vcmp.eq.s32.totalorder %v1641_v26, %v1658_v33  ;;  %v563_v63 = vadd.f32 %v531_v25, %v459_v60  ;;  %vm407_vm12 = vcmp.eq.s32.totalorder %v1644_v27, %v1652_v30 }
  0xba   : > { %1026 = vmatprep.subr.mxu0 %v772_v59  ;;  %v739_v0 = vsel %vm703_vm11, %v1623_v19, 0.0  ;;  %vm479_vm13 = vcmp.eq.s32.totalorder %v1644_v27, %v1654_v31  ;;  %v756_v1 = vadd.f32 %v724_v58, %v652_v61  ;;  %v443_v2 = vsel %vm407_vm12, %v1614_v14, 0.0 }
  0xbb   : > { %v515_v4 = vsel %vm479_vm13, %v1616_v15, 0.0  ;;  %vm583_vm14 = vcmp.eq.s32.totalorder %v1644_v27, %v1656_v32  ;;  %v667_v5 = vadd.f32 %v635_v62, %v563_v63  ;;  %vm687_vm15 = vcmp.eq.s32.totalorder %v1644_v27, %v1658_v33 }
  0xbc   : > { %v547_v26 = vadd.f32 %v515_v4, %v443_v2  ;;  %v619_v6 = vsel %vm583_vm14, %v1618_v16, 0.0  ;;  %1027 = vmatpush3.msra.mxu0 %v756_v1  ;;  %v723_v7 = vsel %vm687_vm15, %v1623_v19, 0.0  ;;  %vm422_vm0 = vcmp.eq.s32.totalorder %v1647_v28, %v1652_v30 }
  0xbd   : > { %vm494_vm1 = vcmp.eq.s32.totalorder %v1647_v28, %v1654_v31  ;;  %vm598_vm2 = vcmp.eq.s32.totalorder %v1647_v28, %v1656_v32  ;;  %v771_v8 = vadd.f32 %v739_v0, %v667_v5  ;;  %v458_v10 = vsel %vm422_vm0, %v1614_v14, 0.0 }
  0xbe   : > { %v651_v9 = vadd.f32 %v619_v6, %v547_v26  ;;  %v530_v11 = vsel %vm494_vm1, %v1616_v15, 0.0  ;;  %v634_v27 = vsel %vm598_vm2, %v1618_v16, 0.0  ;;  %vm702_vm3 = vcmp.eq.s32.totalorder %v1647_v28, %v1658_v33 }
  0xbf   : > { %v562_v12 = vadd.f32 %v530_v11, %v458_v10  ;;  %vm406_vm4 = vcmp.eq.s32.totalorder %v1650_v29, %v1652_v30  ;;  %1028 = vmatprep.subr.mxu0 %v771_v8  ;;  %v738_v17 = vsel %vm702_vm3, %v1623_v19, 0.0  ;;  %vm478_vm5 = vcmp.eq.s32.totalorder %v1650_v29, %v1654_v31 }
  0xc0   : > { %v755_v13 = vadd.f32 %v723_v7, %v651_v9  ;;  %v442_v18 = vsel %vm406_vm4, %v1614_v14, 0.0  ;;  %v514_v20 = vsel %vm478_vm5, %v1616_v15, 0.0  ;;  %vm582_vm6 = vcmp.eq.s32.totalorder %v1650_v29, %v1656_v32 }
  0xc1   : > { %v666_v22 = vadd.f32 %v634_v27, %v562_v12  ;;  %vm686_vm7 = vcmp.eq.s32.totalorder %v1650_v29, %v1658_v33  ;;  %v546_v28 = vadd.f32 %v514_v20, %v442_v18  ;;  %v618_v38 = vsel %vm582_vm6, %v1618_v16, 0.0 }
  0xc2   : > { %1029 = vmatpush3.msra.mxu0 %v755_v13  ;;  %v722_v39 = vsel %vm686_vm7, %v1623_v19, 0.0  ;;  %vm421_vm8 = vcmp.eq.s32.totalorder %v1661_v34, %v1652_v30  ;;  %vm493_vm9 = vcmp.eq.s32.totalorder %v1661_v34, %v1654_v31  ;;  %vm597_vm10 = vcmp.eq.s32.totalorder %v1661_v34, %v1656_v32 }
  0xc3   : > { %v770_v40 = vadd.f32 %v738_v17, %v666_v22  ;;  %v457_v41 = vsel %vm421_vm8, %v1614_v14, 0.0  ;;  %v650_v42 = vadd.f32 %v618_v38, %v546_v28  ;;  %v529_v29 = vsel %vm493_vm9, %v1616_v15, 0.0 }
  0xc4   : > { %v633_v43 = vsel %vm597_vm10, %v1618_v16, 0.0  ;;  %vm701_vm11 = vcmp.eq.s32.totalorder %v1661_v34, %v1658_v33  ;;  %v561_v44 = vadd.f32 %v529_v29, %v457_v41  ;;  %vm405_vm12 = vcmp.eq.s32.totalorder %v1664_v35, %v1652_v30 }
  0xc5   : > { %1030 = vmatprep.subr.mxu0 %v770_v40  ;;  %v737_v21 = vsel %vm701_vm11, %v1623_v19, 0.0  ;;  %vm477_vm13 = vcmp.eq.s32.totalorder %v1664_v35, %v1654_v31  ;;  %v754_v45 = vadd.f32 %v722_v39, %v650_v42  ;;  %v441_v46 = vsel %vm405_vm12, %v1614_v14, 0.0 }
  0xc6   : > { %v513_v47 = vsel %vm477_vm13, %v1616_v15, 0.0  ;;  %vm581_vm14 = vcmp.eq.s32.totalorder %v1664_v35, %v1656_v32  ;;  %v665_v48 = vadd.f32 %v633_v43, %v561_v44  ;;  %vm685_vm15 = vcmp.eq.s32.totalorder %v1664_v35, %v1658_v33 }
  0xc7   : > { %v545_v34 = vadd.f32 %v513_v47, %v441_v46  ;;  %v617_v49 = vsel %vm581_vm14, %v1618_v16, 0.0  ;;  %1031 = vmatpush3.msra.mxu0 %v754_v45  ;;  %v721_v50 = vsel %vm685_vm15, %v1623_v19, 0.0  ;;  %vm420_vm0 = vcmp.eq.s32.totalorder %v1667_v36, %v1652_v30 }
  0xc8   : > { %vm492_vm1 = vcmp.eq.s32.totalorder %v1667_v36, %v1654_v31  ;;  %vm596_vm2 = vcmp.eq.s32.totalorder %v1667_v36, %v1656_v32  ;;  %v769_v51 = vadd.f32 %v737_v21, %v665_v48  ;;  %v456_v52 = vsel %vm420_vm0, %v1614_v14, 0.0 }
  0xc9   : > { %v649_v23 = vadd.f32 %v617_v49, %v545_v34  ;;  %v528_v53 = vsel %vm492_vm1, %v1616_v15, 0.0  ;;  %v632_v35 = vsel %vm596_vm2, %v1618_v16, 0.0  ;;  %vm700_vm3 = vcmp.eq.s32.totalorder %v1667_v36, %v1658_v33 }
  0xca   : > { %v560_v54 = vadd.f32 %v528_v53, %v456_v52  ;;  %vm404_vm4 = vcmp.eq.s32.totalorder %v1670_v37, %v1652_v30  ;;  %1032 = vmatprep.subr.mxu0 %v769_v51  ;;  %v736_v56 = vsel %vm700_vm3, %v1623_v19, 0.0  ;;  %vm476_vm5 = vcmp.eq.s32.totalorder %v1670_v37, %v1654_v31 }
  0xcb   : > { %v753_v55 = vadd.f32 %v721_v50, %v649_v23  ;;  %v440_v24 = vsel %vm404_vm4, %v1614_v14, 0.0  ;;  %v512_v58 = vsel %vm476_vm5, %v1616_v15, 0.0  ;;  %vm580_vm6 = vcmp.eq.s32.totalorder %v1670_v37, %v1656_v32 }
  0xcc   : > { %v664_v57 = vadd.f32 %v632_v35, %v560_v54  ;;  %vm684_vm7 = vcmp.eq.s32.totalorder %v1670_v37, %v1658_v33  ;;  %v544_v36 = vadd.f32 %v512_v58, %v440_v24  ;;  %v616_v59 = vsel %vm580_vm6, %v1618_v16, 0.0 }
  0xcd   : > { %1033 = vmatpush3.msra.mxu0 %v753_v55  ;;  %v720_v60 = vsel %vm684_vm7, %v1623_v19, 0.0  ;;  %v383_v61 = vadd.s32 176, %v1602_v3  ;;  %v367_v62 = vadd.s32 48, %v1602_v3  ;;  %v382_v63 = vadd.s32 168, %v1602_v3 }
  0xce   : > { %v768_v25 = vadd.f32 %v736_v56, %v664_v57  ;;  %v366_v0 = vadd.s32 40, %v1602_v3  ;;  %v648_v1 = vadd.f32 %v616_v59, %v544_v36  ;;  %v381_v43 = vadd.s32 160, %v1602_v3 }
  0xcf   : > { %vm419_vm8 = vcmp.eq.s32.totalorder %v383_v61, %v1652_v30  ;;  %vm491_vm9 = vcmp.eq.s32.totalorder %v383_v61, %v1654_v31  ;;  %vm595_vm10 = vcmp.eq.s32.totalorder %v383_v61, %v1656_v32  ;;  %vm699_vm11 = vcmp.eq.s32.totalorder %v383_v61, %v1658_v33 }
  0xd0   : > { %1034 = vmatprep.subr.mxu0 %v768_v25  ;;  %v455_v37 = vsel %vm419_vm8, %v1614_v14, 0.0  ;;  %v527_v2 = vsel %vm491_vm9, %v1616_v15, 0.0  ;;  %v631_v4 = vsel %vm595_vm10, %v1618_v16, 0.0  ;;  %v752_v5 = vadd.f32 %v720_v60, %v648_v1 }
  0xd1   : > { %v559_v26 = vadd.f32 %v527_v2, %v455_v37  ;;  %v735_v6 = vsel %vm699_vm11, %v1623_v19, 0.0  ;;  %vm403_vm12 = vcmp.eq.s32.totalorder %v367_v62, %v1652_v30  ;;  %vm475_vm13 = vcmp.eq.s32.totalorder %v367_v62, %v1654_v31 }
  0xd2   : > { %v439_v7 = vsel %vm403_vm12, %v1614_v14, 0.0  ;;  %vm579_vm14 = vcmp.eq.s32.totalorder %v367_v62, %v1656_v32  ;;  %vm683_vm15 = vcmp.eq.s32.totalorder %v367_v62, %v1658_v33  ;;  %1035 = vmatpush3.msra.mxu0 %v752_v5  ;;  %v511_v9 = vsel %vm475_vm13, %v1616_v15, 0.0 }
  0xd3   : > { %v663_v8 = vadd.f32 %v631_v4, %v559_v26  ;;  %v615_v10 = vsel %vm579_vm14, %v1618_v16, 0.0  ;;  %v719_v11 = vsel %vm683_vm15, %v1623_v19, 0.0  ;;  %v543_v12 = vadd.f32 %v511_v9, %v439_v7 }
  0xd4   : > { %vm418_vm0 = vcmp.eq.s32.totalorder %v382_v63, %v1652_v30  ;;  %vm490_vm1 = vcmp.eq.s32.totalorder %v382_v63, %v1654_v31  ;;  %vm594_vm2 = vcmp.eq.s32.totalorder %v382_v63, %v1656_v32  ;;  %vm698_vm3 = vcmp.eq.s32.totalorder %v382_v63, %v1658_v33 }
  0xd5   : > { %v767_v27 = vadd.f32 %v735_v6, %v663_v8  ;;  %v454_v13 = vsel %vm418_vm0, %v1614_v14, 0.0  ;;  %v526_v17 = vsel %vm490_vm1, %v1616_v15, 0.0  ;;  %v630_v18 = vsel %vm594_vm2, %v1618_v16, 0.0 }
  0xd6   : > { %v647_v22 = vadd.f32 %v615_v10, %v543_v12  ;;  %v558_v20 = vadd.f32 %v526_v17, %v454_v13  ;;  %vm402_vm4 = vcmp.eq.s32.totalorder %v366_v0, %v1652_v30  ;;  %v734_v28 = vsel %vm698_vm3, %v1623_v19, 0.0 }
  0xd7   : > { %1036 = vmatprep.subr.mxu0 %v767_v27  ;;  %v438_v38 = vsel %vm402_vm4, %v1614_v14, 0.0  ;;  %vm474_vm5 = vcmp.eq.s32.totalorder %v366_v0, %v1654_v31  ;;  %vm578_vm6 = vcmp.eq.s32.totalorder %v366_v0, %v1656_v32  ;;  %vm682_vm7 = vcmp.eq.s32.totalorder %v366_v0, %v1658_v33 }
  0xd8   : > { %v751_v39 = vadd.f32 %v719_v11, %v647_v22  ;;  %v662_v40 = vadd.f32 %v630_v18, %v558_v20  ;;  %v510_v41 = vsel %vm474_vm5, %v1616_v15, 0.0  ;;  %v614_v42 = vsel %vm578_vm6, %v1618_v16, 0.0 }
  0xd9   : > { %v542_v29 = vadd.f32 %v510_v41, %v438_v38  ;;  %v365_v44 = vadd.s32 32, %v1602_v3  ;;  %v718_v45 = vsel %vm682_vm7, %v1623_v19, 0.0  ;;  %v380_v46 = vadd.s32 152, %v1602_v3 }
  0xda   : > { %1037 = vmatpush3.msra.mxu0 %v751_v39  ;;  %v766_v21 = vadd.f32 %v734_v28, %v662_v40  ;;  %v364_v47 = vadd.s32 24, %v1602_v3  ;;  %vm417_vm8 = vcmp.eq.s32.totalorder %v381_v43, %v1652_v30  ;;  %vm489_vm9 = vcmp.eq.s32.totalorder %v381_v43, %v1654_v31 }
  0xdb   : > { %v646_v48 = vadd.f32 %v614_v42, %v542_v29  ;;  %vm593_vm10 = vcmp.eq.s32.totalorder %v381_v43, %v1656_v32  ;;  %v453_v34 = vsel %vm417_vm8, %v1614_v14, 0.0  ;;  %v525_v49 = vsel %vm489_vm9, %v1616_v15, 0.0 }
  0xdc   : > { %1038 = vmatprep.subr.mxu0 %v766_v21  ;;  %v629_v50 = vsel %vm593_vm10, %v1618_v16, 0.0  ;;  %vm697_vm11 = vcmp.eq.s32.totalorder %v381_v43, %v1658_v33  ;;  %v557_v23 = vadd.f32 %v525_v49, %v453_v34  ;;  %vm401_vm12 = vcmp.eq.s32.totalorder %v365_v44, %v1652_v30 }
  0xdd   : > { %v750_v51 = vadd.f32 %v718_v45, %v646_v48  ;;  %v733_v52 = vsel %vm697_vm11, %v1623_v19, 0.0  ;;  %v437_v53 = vsel %vm401_vm12, %v1614_v14, 0.0  ;;  %vm473_vm13 = vcmp.eq.s32.totalorder %v365_v44, %v1654_v31 }
  0xde   : > { %vm577_vm14 = vcmp.eq.s32.totalorder %v365_v44, %v1656_v32  ;;  %vm681_vm15 = vcmp.eq.s32.totalorder %v365_v44, %v1658_v33  ;;  %v661_v54 = vadd.f32 %v629_v50, %v557_v23  ;;  %v509_v35 = vsel %vm473_vm13, %v1616_v15, 0.0 }
  0xdf   : > { %1039 = vmatpush3.msra.mxu0 %v750_v51  ;;  %v613_v55 = vsel %vm577_vm14, %v1618_v16, 0.0  ;;  %v717_v56 = vsel %vm681_vm15, %v1623_v19, 0.0  ;;  %v541_v24 = vadd.f32 %v509_v35, %v437_v53  ;;  %vm416_vm0 = vcmp.eq.s32.totalorder %v380_v46, %v1652_v30 }
  0xe0   : > { %vm488_vm1 = vcmp.eq.s32.totalorder %v380_v46, %v1654_v31  ;;  %vm592_vm2 = vcmp.eq.s32.totalorder %v380_v46, %v1656_v32  ;;  %v765_v57 = vadd.f32 %v733_v52, %v661_v54  ;;  %v452_v58 = vsel %vm416_vm0, %v1614_v14, 0.0 }
  0xe1   : > { %v524_v36 = vsel %vm488_vm1, %v1616_v15, 0.0  ;;  %v628_v59 = vsel %vm592_vm2, %v1618_v16, 0.0  ;;  %v645_v60 = vadd.f32 %v613_v55, %v541_v24  ;;  %vm696_vm3 = vcmp.eq.s32.totalorder %v380_v46, %v1658_v33 }
  0xe2   : > { %v556_v61 = vadd.f32 %v524_v36, %v452_v58  ;;  %vm400_vm4 = vcmp.eq.s32.totalorder %v364_v47, %v1652_v30  ;;  %1040 = vmatprep.subr.mxu0 %v765_v57  ;;  %v732_v25 = vsel %vm696_vm3, %v1623_v19, 0.0  ;;  %vm472_vm5 = vcmp.eq.s32.totalorder %v364_v47, %v1654_v31 }
  0xe3   : > { %v436_v62 = vsel %vm400_vm4, %v1614_v14, 0.0  ;;  %vm576_vm6 = vcmp.eq.s32.totalorder %v364_v47, %v1656_v32  ;;  %v749_v63 = vadd.f32 %v717_v56, %v645_v60  ;;  %v508_v1 = vsel %vm472_vm5, %v1616_v15, 0.0 }
  0xe4   : > { %v660_v0 = vadd.f32 %v628_v59, %v556_v61  ;;  %v612_v37 = vsel %vm576_vm6, %v1618_v16, 0.0  ;;  %v540_v2 = vadd.f32 %v508_v1, %v436_v62  ;;  %vm680_vm7 = vcmp.eq.s32.totalorder %v364_v47, %v1658_v33  ;;  %v777_v61 = vld [vmem:[%s277_s24] sm:$0xff] }
  0xe5   : > { %v379_v4 = vadd.s32 144, %v1602_v3  ;;  %v363_v5 = vadd.s32 16, %v1602_v3  ;;  %1041 = vmatpush3.msra.mxu0 %v749_v63  ;;  %v716_v6 = vsel %vm680_vm7, %v1623_v19, 0.0  ;;  %v378_v7 = vadd.s32 136, %v1602_v3 }
  0xe6   : > { %v764_v26 = vadd.f32 %v732_v25, %v660_v0  ;;  %v362_v8 = vadd.s32 8, %v1602_v3  ;;  %v644_v9 = vadd.f32 %v612_v37, %v540_v2  ;;  %v377_v50 = vadd.s32 128, %v1602_v3 }
  0xe7   : > { %vm415_vm8 = vcmp.eq.s32.totalorder %v379_v4, %v1652_v30  ;;  %vm487_vm9 = vcmp.eq.s32.totalorder %v379_v4, %v1654_v31  ;;  %vm591_vm10 = vcmp.eq.s32.totalorder %v379_v4, %v1656_v32  ;;  %vm695_vm11 = vcmp.eq.s32.totalorder %v379_v4, %v1658_v33 }
  0xe8   : > { %1042 = vmatprep.subr.mxu0 %v764_v26  ;;  %v451_v10 = vsel %vm415_vm8, %v1614_v14, 0.0  ;;  %v523_v11 = vsel %vm487_vm9, %v1616_v15, 0.0  ;;  %v627_v12 = vsel %vm591_vm10, %v1618_v16, 0.0  ;;  %v748_v27 = vadd.f32 %v716_v6, %v644_v9 }
  0xe9   : > { %v555_v13 = vadd.f32 %v523_v11, %v451_v10  ;;  %v731_v17 = vsel %vm695_vm11, %v1623_v19, 0.0  ;;  %vm399_vm12 = vcmp.eq.s32.totalorder %v363_v5, %v1652_v30  ;;  %vm471_vm13 = vcmp.eq.s32.totalorder %v363_v5, %v1654_v31 }
  0xea   : > { %v435_v18 = vsel %vm399_vm12, %v1614_v14, 0.0  ;;  %vm575_vm14 = vcmp.eq.s32.totalorder %v363_v5, %v1656_v32  ;;  %vm679_vm15 = vcmp.eq.s32.totalorder %v363_v5, %v1658_v33  ;;  %1043 = vmatpush3.msra.mxu0 %v748_v27  ;;  %v507_v20 = vsel %vm471_vm13, %v1616_v15, 0.0 }
  0xeb   : > { %v659_v22 = vadd.f32 %v627_v12, %v555_v13  ;;  %v611_v28 = vsel %vm575_vm14, %v1618_v16, 0.0  ;;  %v715_v38 = vsel %vm679_vm15, %v1623_v19, 0.0  ;;  %v539_v39 = vadd.f32 %v507_v20, %v435_v18 }
  0xec   : > { %vm414_vm0 = vcmp.eq.s32.totalorder %v378_v7, %v1652_v30  ;;  %vm486_vm1 = vcmp.eq.s32.totalorder %v378_v7, %v1654_v31  ;;  %vm590_vm2 = vcmp.eq.s32.totalorder %v378_v7, %v1656_v32  ;;  %vm694_vm3 = vcmp.eq.s32.totalorder %v378_v7, %v1658_v33 }
  0xed   : > { %v763_v40 = vadd.f32 %v731_v17, %v659_v22  ;;  %v450_v41 = vsel %vm414_vm0, %v1614_v14, 0.0  ;;  %v522_v42 = vsel %vm486_vm1, %v1616_v15, 0.0  ;;  %v626_v29 = vsel %vm590_vm2, %v1618_v16, 0.0 }
  0xee   : > { %v643_v43 = vadd.f32 %v611_v28, %v539_v39  ;;  %v554_v44 = vadd.f32 %v522_v42, %v450_v41  ;;  %vm398_vm4 = vcmp.eq.s32.totalorder %v362_v8, %v1652_v30  ;;  %v730_v21 = vsel %vm694_vm3, %v1623_v19, 0.0 }
  0xef   : > { %1044 = vmatprep.subr.mxu0 %v763_v40  ;;  %v434_v45 = vsel %vm398_vm4, %v1614_v14, 0.0  ;;  %vm470_vm5 = vcmp.eq.s32.totalorder %v362_v8, %v1654_v31  ;;  %vm574_vm6 = vcmp.eq.s32.totalorder %v362_v8, %v1656_v32  ;;  %vm678_vm7 = vcmp.eq.s32.totalorder %v362_v8, %v1658_v33 }
  0xf0   : > { %v747_v46 = vadd.f32 %v715_v38, %v643_v43  ;;  %v658_v47 = vadd.f32 %v626_v29, %v554_v44  ;;  %v506_v48 = vsel %vm470_vm5, %v1616_v15, 0.0  ;;  %v610_v34 = vsel %vm574_vm6, %v1618_v16, 0.0 }
  0xf1   : > { %v538_v49 = vadd.f32 %v506_v48, %v434_v45  ;;  %vm397_vm8 = vcmp.eq.s32.totalorder %v1602_v3, %v1652_v30  ;;  %v714_v23 = vsel %vm678_vm7, %v1623_v19, 0.0  ;;  %vm469_vm9 = vcmp.eq.s32.totalorder %v1602_v3, %v1654_v31 }
  0xf2   : > { %1045 = vmatpush3.msra.mxu0 %v747_v46  ;;  %v762_v51 = vadd.f32 %v730_v21, %v658_v47  ;;  %v433_v52 = vsel %vm397_vm8, %v1614_v14, 0.0  ;;  %vm413_vm10 = vcmp.eq.s32.totalorder %v377_v50, %v1652_v30  ;;  %vm485_vm11 = vcmp.eq.s32.totalorder %v377_v50, %v1654_v31 }
  0xf3   : > { %v642_v53 = vadd.f32 %v610_v34, %v538_v49  ;;  %vm589_vm12 = vcmp.eq.s32.totalorder %v377_v50, %v1656_v32  ;;  %v449_v54 = vsel %vm413_vm10, %v1614_v14, 0.0  ;;  %v521_v35 = vsel %vm485_vm11, %v1616_v15, 0.0 }
  0xf4   : > { %1046 = vmatprep.subr.mxu0 %v762_v51  ;;  %v625_v55 = vsel %vm589_vm12, %v1618_v16, 0.0  ;;  %vm693_vm13 = vcmp.eq.s32.totalorder %v377_v50, %v1658_v33  ;;  %v553_v24 = vadd.f32 %v521_v35, %v449_v54  ;;  %v505_v57 = vsel %vm469_vm9, %v1616_v15, 0.0 }
  0xf5   : > { %v746_v56 = vadd.f32 %v714_v23, %v642_v53  ;;  %v729_v30 = vsel %vm693_vm13, %v1623_v19, 0.0  ;;  %v537_v31 = vadd.f32 %v505_v57, %v433_v52  ;;  %vm573_vm14 = vcmp.eq.s32.totalorder %v1602_v3, %v1656_v32  ;;  %v779_v32 = vld [vmem:[%s1592_s10] sm:$0xff] }
  0xf6   : > { %vm677_vm15 = vcmp.eq.s32.totalorder %v1602_v3, %v1658_v33  ;;  %v657_v14 = vadd.f32 %v625_v55, %v553_v24  ;;  %v609_v58 = vsel %vm573_vm14, %v1618_v16, 0.0 }
  0xf7   : > { %1047 = vmatpush3.msra.mxu0 %v746_v56  ;;  %v713_v36 = vsel %vm677_vm15, %v1623_v19, 0.0  ;;  %v641_v59 = vadd.f32 %v609_v58, %v537_v31 }
  0xf8   : > { %v761_v60 = vadd.f32 %v729_v30, %v657_v14 }
  0xf9   : > { %v745_v15 = vadd.f32 %v713_v36, %v641_v59 }
  0xfa   : > { %1048 = vmatprep.subr.mxu0 %v761_v60 }
  0xfb   : > { %1049 = vmatpush3.msra.mxu0 %v745_v15 }
  0xfc   : > { %845 = vmatmul.mubr.f32.vlgmr.msra.gmra.mxu0 %v777_v61 }
 0x1bc   : > { %v1050_v25 = vpop.f32.mrf.mxu0 }
 0x1be   : > { %v1051_v62 = vpop.f32.mrf.mxu0 }
 0x1bf   : > { %v1052_v63 = vadd.f32 %v1051_v62, %v1050_v25 }
 0x1c1   : > { %v850_v3 = vadd.f32 %v1052_v63, %v779_v32 }
 0x1c3   : > { %851 = vst [vmem:[%s1592_s10] sm:$0xff] %v850_v3 }
 0x1c4 PF: > { %s865_s19 = scalar_lea.hbm %s2063_s5, %s1587_s23  ;;  %s867_s13 = sshll.u32 %s1592_s10, 4  ;;  %s868_s13 = int_to_ptr.vmem [resolvable:$true] %s867_s13 }
 0x1c5   : > { %s853_s11 = scalar_lea.sflag [#allocation7], %s1570_s16  ;;  %s1231_s17 = scalar_lea.vmem %s868_s13, 128 }
 0x1c6   : > { %p1232_p13 = scmp.ne.s32.totalorder %s868_s13, %s1231_s17  ;;  %p2097_p7 = scmp.ne.s32.totalorder %s2082_s21, 0 }
 0x1c7   : > { %s1348_s29 = smov [#allocation10]  }
 0x1c8   : > { %p1233_p2 = pnand %p1232_p13, %p2097_p7  ;;  %s1235_s22 = sshll.u32 %s1348_s29, 4  ;;  %s1236_s22 = int_to_ptr.vmem [resolvable:$false] %s1235_s22 }
 0x1c9   : > { %s1237_s14 = scalar_lea.vmem %s1236_s22, 256  ;;  %p1238_p11 = scmp.lt.s32.totalorder %s868_s13, %s1236_s22 }
 0x1ca   : > { %p1234_p10 = pneg %p1233_p2  ;;  %p1239_p1 = scmp.lt.s32.totalorder %s1237_s14, %s1231_s17 }
 0x1cc   : > { %p1240_p6 = por %p1239_p1, %p1238_p11 }
 0x1ce   : > { %p1241_p0 = pnand %p1240_p6, %p1234_p10 }
 0x1d0   : > { %1244 = shalt.err (!%p1241_p0)
}
 0x1d1   : > { %s1245_s24 = scalar_lea.hbm %s865_s19, 128  ;;  %s1249_s18 = scalar_lea.hbm %s2063_s5, 256 }
 0x1d2   : > { %p1246_p8 = scmp.ne.s32.totalorder %s865_s19, %s1245_s24  ;;  %p1250_p3 = scmp.lt.s32.totalorder %s865_s19, %s2063_s5 }
 0x1d3   : > { %p1251_p12 = scmp.lt.s32.totalorder %s1249_s18, %s1245_s24 }
 0x1d4   : > { %p1247_p9 = pnand %p1246_p8, %p2097_p7 }
 0x1d5   : > { %p1252_p4 = por %p1251_p12, %p1250_p3 }
 0x1d6   : > { %p1248_p5 = pneg %p1247_p9 }
 0x1d8   : > { %p1253_p13 = pnand %p1252_p4, %p1248_p5 }
 0x1da   : > { %1256 = shalt.err (!%p1253_p13)
}
 0x1db   : > { %1059 = dma.vmem_to_hbm [thread:$0]  (%p2097_p7), %s868_s13, 128, %s865_s19, %s853_s11  }
 0x1dc PF: > { %s2098_s25 = sld [smem:[#allocation17_spill]]  ;;  %p2101_p10 = scmp.ge.s32.totalorder %s1341_s9, 2 }
 0x1dd   : > { %s2099_s15 = sld [smem:[#allocation21_spill]] }
 0x1e2   : > { %s879_s0 = sand.u32 1, %s2098_s25  }
 0x1e3   : > { %p2100_p2 = scmp.ne.s32.totalorder %s2099_s15, 0  ;;  %s880_s26 = scalar_lea.sflag [#allocation7], %s879_s0 }
 0x1e5   : > { %p1071_p11 = pnand %p2101_p10, %p2100_p2 }
 0x1e7   : > { %p1072_p1 = pneg %p1071_p11 }
 0x1e9   : > { %1304 = dma.done.wait (%p1072_p1), %s880_s26, 128  }
 0x1ea   : > { %1306 = vsyncadd (%p1072_p1), %s880_s26, 4294967168  ;;  %s34_s9 = sadd.s32 1, %s1341_s9   ;;  %s2102_s3 = smov %s1541_s1 }
 0x1eb   : > { %p31_p6 = scmp.ge.s32.totalorder %s34_s9, 4   ;;  %s2103_s21 = sld [smem:[#allocation18_spill]] }
 0x1ec   : > { %s2104_s6 = sld [smem:[#allocation20_spill]]  ;;  %s2106_s1 = smov %s1313_s27 }
 0x1ed   : > { %s2105_s12 = sld [smem:[#allocation19_spill]]  ;;  %s2107_s27 = smov %s1317_s28 }
 0x1ee   : > { %s2108_s28 = smov %s2102_s3  ;;  %s2109_s29 = smov %s1325_s30 }
 0x1ef   : > { %s2111_s7 = smov %s1337_s8  ;;  %33 = sbr.rel (!%p31_p6) target bundleno = 36 (0x24), region = 101 }
 0x1f1   : > { %s2110_s30 = smov %s2103_s21 }
 0x1f3   : > { %s2112_s8 = smov %s2105_s12 }
 0x1f4   :  { %885 = vsyncpa [#allocation6], 1 }
 0x1f5   :  { %887 = vsyncpa [#allocation6 + $0x1], 1 }
 0x1f6   :  { %888 = vsyncpa [#allocation9], 1 }
 0x1f7   :  { %890 = vsyncpa [#allocation9 + $0x1], 1 }
 0x1f8   :  { %891 = vsyncpa [#allocation7], 1 }
 0x1f9   :  { %893 = vsyncpa [#allocation7 + $0x1], 1 }

</bundles_post_ra>
